<compile_context>
chip_gen: v7x
topology: tpu7x:2x2x1
jax: 0.10.0
libtpu: 0.0.40
codegen_flags: <defaults>
</compile_context>

<pallas_src>
import functools

import jax
import jax.numpy as jnp
from jax.experimental import pallas as pl
from jax.experimental.pallas import tpu as pltpu


# --------------------------------------------------------------------------
# VMEM footprint estimate & batch-tile selection
# --------------------------------------------------------------------------
def _footprint_bytes(bB, T, Din, HD, H):
    f = 4
    x_b = 2 * bB * T * Din * f          # x block, double-buffered
    w_b = 2 * Din * HD * f              # fused weight
    b_b = 2 * HD * f                    # bias
    m_b = 2 * 2 * bB * T * f            # mask + softmax_mask
    sel_b = 2 * H * HD * f              # head selector
    o_b = 2 * bB * HD * f               # output block
    p_b = bB * T * HD * f               # projected activations (resident)
    work = (6 * bB * H * T + 4 * bB * H * HD) * f   # q/e/a + sf/zf live values
    return x_b + w_b + b_b + m_b + sel_b + o_b + p_b + work


def _pick_batch_tile(B, T, Din, HD, H, budget=32 * 1024 * 1024):
    """Batch tile: full B for small batches, else a multiple of 8 that fits VMEM
    (and gives >=2 grid steps so both v7x TensorCores get work)."""
    if B <= 8:
        return B
    bB = max(8, ((B // 2) // 8) * 8)
    while bB > 8 and _footprint_bytes(bB, T, Din, HD, H) > budget:
        bB = max(8, ((bB // 2) // 8) * 8)
    return bB


# --------------------------------------------------------------------------
# Pallas kernel: all heads fused, full r-step recurrence, one batch tile
# --------------------------------------------------------------------------
def _dsa_kernel(x_ref, w_ref, b_ref, m_ref, sm_ref, sel_ref, o_ref, *,
                r, neg_slope, matmul_dtype):
    # x_ref:   (bB, T, Din)   input batch tile (channels-last)
    # w_ref:   (Din, H*D)     fused head-major projection weight
    # b_ref:   (1, H*D)       fused bias
    # m_ref:   (bB, T)        0/1 float mask
    # sm_ref:  (bB, T)        softmax_mask (1.0 valid / -1e20 pad), hoisted
    # sel_ref: (H, H*D)       block-diagonal head selector, hoisted
    # o_ref:   (bB, H*D)      concatenated head outputs (final layout)
    bB, T, Din = x_ref.shape
    HD = w_ref.shape[1]
    H = sel_ref.shape[0]

    x = x_ref[...]
    w = w_ref[...]
    b = b_ref[...]
    m = m_ref[...]
    sm = sm_ref[...]
    sel = sel_ref[...]

    # ---- fused projection for all heads: one lane-dense MXU matmul --------
    x2 = x.reshape(bB * T, Din)
    if matmul_dtype != jnp.float32:
        x2 = x2.astype(matmul_dtype)
        w = w.astype(matmul_dtype)
    p2 = jnp.dot(x2, w, preferred_element_type=jnp.float32) + b
    p2 = jnp.where(p2 >= 0.0, p2, jnp.float32(neg_slope) * p2)   # leaky_relu
    p = p2.reshape(bB, T, HD)                                    # (bB, T, H*D)

    # Broadcasts hoisted out of the r-loop (JAX does not CSE broadcast_in_dim).
    smb = jnp.broadcast_to(sm[:, None, :], (bB, H, T))
    mb = jnp.broadcast_to(m[:, None, :], (bB, H, T))

    q0 = jnp.zeros((bB, H, T), jnp.float32)
    zf0 = jnp.zeros((bB, H, HD), jnp.float32)

    def step(carry):
        q, _ = carry
        q = q * smb                                    # multiplicative pad mask
        qmax = jnp.max(q, axis=-1, keepdims=True)      # stable softmax over T
        e = jnp.exp(q - qmax)
        a = (e / jnp.sum(e, axis=-1, keepdims=True)) * mb      # (bB, H, T)
        # All-heads contraction on the MXU (flash-style single-batch einsums);
        # per-head z lives on the block-diagonal of (H, H*D), selected by sel.
        sf = jnp.einsum("bht,btn->bhn", a, p,
                        preferred_element_type=jnp.float32)     # (bB, H, H*D)
        zf = jnp.tanh(sf) * sel                                 # block-diag z
        q = q + jnp.einsum("bhn,btn->bht", zf, p,
                           preferred_element_type=jnp.float32)  # (bB, H, T)
        return q, zf

    if r <= 4:                         # small r: unroll (LLO scheduler visibility)
        carry = (q0, zf0)
        for _ in range(r):
            carry = step(carry)
        _, zf = carry
    else:                              # large r: bound live ranges
        _, zf = jax.lax.fori_loop(0, r, lambda i, c: step(c), (q0, zf0))

    # Off-diagonal entries of zf are exactly zero, so summing over the head
    # axis yields the head-major concatenation directly: o[b, h*D+d] = z_h[b,d].
    o_ref[...] = jnp.sum(zf, axis=1).astype(o_ref.dtype)


def dsa_forward(x, mask, w_stack, b_stack, *, r, neg_slope=0.01,
                use_bf16_matmul=False):
    """x: (B,T,Din); mask: (B,T); w_stack: (H,Din,D); b_stack: (H,D) -> (B, H*D)."""
    B, T, Din = x.shape
    H, _, D = w_stack.shape
    HD = H * D

    x = x.astype(jnp.float32)
    maskf = mask.astype(jnp.float32)
    # Hoisted out of the kernel (computed once, not per grid step).
    softmax_mask = jnp.where(maskf == 0.0, jnp.float32(-1e20), jnp.float32(1.0))
    # Fused head-major weight/bias: W_all[:, h*D + d] == w_stack[h, :, d].
    w_all = jnp.transpose(w_stack, (1, 0, 2)).reshape(Din, HD).astype(jnp.float32)
    b_all = b_stack.reshape(1, HD).astype(jnp.float32)
    # Static block-diagonal head selector (H, H*D).
    sel = (jnp.arange(HD)[None, :] // D == jnp.arange(H)[:, None]).astype(jnp.float32)

    bB = _pick_batch_tile(B, T, Din, HD, H)
    grid = (pl.cdiv(B, bB),)

    fp = _footprint_bytes(bB, T, Din, HD, H)
    vmem_limit = int(min(96 * 1024 * 1024, max(32 * 1024 * 1024, 2 * fp)))

    cost = pl.CostEstimate(
        flops=2 * B * T * Din * HD + r * (4 * B * H * T * HD),
        transcendentals=r * (B * H * T + B * H * HD),
        bytes_accessed=4 * (B * T * Din + Din * HD + HD + 2 * B * T
                            + H * HD + B * HD),
    )

    kernel = functools.partial(
        _dsa_kernel, r=r, neg_slope=neg_slope,
        matmul_dtype=jnp.bfloat16 if use_bf16_matmul else jnp.float32)

    out = pl.pallas_call(
        kernel,
        out_shape=jax.ShapeDtypeStruct((B, HD), jnp.float32),
        grid=grid,
        in_specs=[
            pl.BlockSpec((bB, T, Din), lambda i: (i, 0, 0)),   # x batch tile
            pl.BlockSpec((Din, HD), lambda i: (0, 0)),         # fused weight
            pl.BlockSpec((1, HD), lambda i: (0, 0)),           # fused bias
            pl.BlockSpec((bB, T), lambda i: (i, 0)),           # mask
            pl.BlockSpec((bB, T), lambda i: (i, 0)),           # softmax_mask
            pl.BlockSpec((H, HD), lambda i: (0, 0)),           # head selector
        ],
        out_specs=pl.BlockSpec((bB, HD), lambda i: (i, 0)),    # lane-dense, final layout
        compiler_params=pltpu.CompilerParams(
            dimension_semantics=("parallel",),
            vmem_limit_bytes=vmem_limit),
        cost_estimate=cost,
    )(x, w_all, b_all, maskf, softmax_mask, sel)
    return out


# --------------------------------------------------------------------------
# DSA module (deterministic PyTorch-like init of the per-head Linear layers)
# --------------------------------------------------------------------------
class DSAPallas:
    def __init__(self, dsa_num_attentions, dsa_input_dim, dsa_dim, dsa_r, key):
        self.dsa_r = dsa_r
        self.last_dim = dsa_num_attentions * dsa_dim
        bound = 1.0 / (dsa_input_dim ** 0.5)
        kw, kb = jax.random.split(key)
        # stored as (in, out) so y = x @ W + b
        self.w = jax.random.uniform(
            kw, (dsa_num_attentions, dsa_input_dim, dsa_dim),
            jnp.float32, -bound, bound)
        self.b = jax.random.uniform(
            kb, (dsa_num_attentions, dsa_dim), jnp.float32, -bound, bound)

    def __call__(self, x, mask):
        return dsa_forward(x, mask, self.w, self.b, r=self.dsa_r)


# --------------------------------------------------------------------------
# Pure-JAX reference (for correctness verification of the Pallas kernel)
# --------------------------------------------------------------------------
def _dsa_ref(w_stack, b_stack, x, mask, r, neg_slope=0.01):
    maskf = mask.astype(jnp.float32)
    softmax_mask = jnp.where(maskf == 0.0, jnp.float32(-1e20), jnp.float32(1.0))
    z_list = []
    for j in range(w_stack.shape[0]):
        p = jnp.dot(x, w_stack[j], precision=jax.lax.Precision.HIGHEST) + b_stack[j]
        p = jnp.where(p >= 0.0, p, neg_slope * p)
        q = jnp.zeros_like(maskf)
        z = None
        for _ in range(r):
            q = q * softmax_mask
            qmax = jnp.max(q, axis=-1, keepdims=True)
            e = jnp.exp(q - qmax)
            a = e / jnp.sum(e, axis=-1, keepdims=True)
            a = a * maskf
            s = jnp.sum(a[:, :, None] * p, axis=1)
            z = jnp.tanh(s)
            q = q + jnp.sum(p * z[:, None, :], axis=-1)
        z_list.append(z)
    return jnp.concatenate(z_list, axis=-1)


# --------------------------------------------------------------------------
if __name__ == "__main__":
    import numpy as np

    key = jax.random.PRNGKey(0)
    k_x, k_m, k_params = jax.random.split(key, 3)

    # Small shapes consistent with the module.
    B, T = 2, 16
    dsa_num_attentions = 4
    dsa_input_dim = 32
    dsa_dim = 16
    # NOTE: the original module's `q *= -1e20` masking amplifies |q| by ~1e20
    # per iteration at padded positions, overflowing f32 to inf/NaN for r >= 3
    # with generic inputs (a property of the PyTorch code itself); we test with
    # r = 2, which exercises the same code path with finite values.
    dsa_r = 2

    x = jax.random.normal(k_x, (B, T, dsa_input_dim), jnp.float32)
    mask = (jax.random.uniform(k_m, (B, T)) > 0.2).astype(jnp.float32)

    net = DSAPallas(dsa_num_attentions, dsa_input_dim, dsa_dim, dsa_r, k_params)

    out = jax.block_until_ready(net(x, mask))
    ref = jax.block_until_ready(_dsa_ref(net.w, net.b, x, mask, r=dsa_r))

    assert out.shape == (B, dsa_num_attentions * dsa_dim), out.shape
    np.testing.assert_allclose(np.asarray(out), np.asarray(ref),
                               rtol=5e-4, atol=5e-4)
    print("KERNEL_OK")
</pallas_src>

<mosaic_0001>
module attributes {stable_mosaic.version = 11 : i64} {
  func.func @_dsa_kernel(%arg0: i32, %arg1: memref<2x16x32xf32, #tpu.memory_space<vmem>>, %arg2: memref<32x64xf32, #tpu.memory_space<vmem>>, %arg3: memref<1x64xf32, #tpu.memory_space<vmem>>, %arg4: memref<2x16xf32, #tpu.memory_space<vmem>>, %arg5: memref<2x16xf32, #tpu.memory_space<vmem>>, %arg6: memref<4x64xf32, #tpu.memory_space<vmem>>, %arg7: memref<2x64xf32, #tpu.memory_space<vmem>>) attributes {dimension_semantics = [#tpu.dimension_semantics<parallel>], iteration_bounds = array<i64: 1>, scalar_prefetch = 0 : i64, scratch_operands = 0 : i64, tpu.core_type = #tpu.core_type<tc>, window_params = [{transform_indices = @transform_0, window_bounds = array<i64: 2, 16, 32>}, {pipeline_mode = #tpu.pipeline_mode<synchronous>, transform_indices = @transform_1, window_bounds = array<i64: 32, 64>}, {pipeline_mode = #tpu.pipeline_mode<synchronous>, transform_indices = @transform_2, window_bounds = array<i64: 1, 64>}, {transform_indices = @transform_3, window_bounds = array<i64: 2, 16>}, {transform_indices = @transform_4, window_bounds = array<i64: 2, 16>}, {pipeline_mode = #tpu.pipeline_mode<synchronous>, transform_indices = @transform_5, window_bounds = array<i64: 4, 64>}, {transform_indices = @transform_6, window_bounds = array<i64: 2, 64>}]} {
    %c0 = arith.constant 0 : index
    %c0_0 = arith.constant 0 : index
    %c0_1 = arith.constant 0 : index
    %0 = vector.load %arg1[%c0, %c0_0, %c0_1] : memref<2x16x32xf32, #tpu.memory_space<vmem>>, vector<2x16x32xf32>
    %c0_2 = arith.constant 0 : index
    %c0_3 = arith.constant 0 : index
    %1 = vector.load %arg2[%c0_2, %c0_3] : memref<32x64xf32, #tpu.memory_space<vmem>>, vector<32x64xf32>
    %c0_4 = arith.constant 0 : index
    %c0_5 = arith.constant 0 : index
    %2 = vector.load %arg3[%c0_4, %c0_5] : memref<1x64xf32, #tpu.memory_space<vmem>>, vector<1x64xf32>
    %c0_6 = arith.constant 0 : index
    %c0_7 = arith.constant 0 : index
    %3 = vector.load %arg4[%c0_6, %c0_7] : memref<2x16xf32, #tpu.memory_space<vmem>>, vector<2x16xf32>
    %c0_8 = arith.constant 0 : index
    %c0_9 = arith.constant 0 : index
    %4 = vector.load %arg5[%c0_8, %c0_9] : memref<2x16xf32, #tpu.memory_space<vmem>>, vector<2x16xf32>
    %c0_10 = arith.constant 0 : index
    %c0_11 = arith.constant 0 : index
    %5 = vector.load %arg6[%c0_10, %c0_11] : memref<4x64xf32, #tpu.memory_space<vmem>>, vector<4x64xf32>
    %6 = vector.shape_cast %0 : vector<2x16x32xf32> to vector<32x32xf32>
    %cst = arith.constant dense<0.000000e+00> : vector<32x64xf32>
    %7 = tpu.matmul %6, %1, %cst {dimension_numbers = #tpu.dot_dimension_numbers<[1], [0], [0], [1], [0, 0, 1, 1], [], []>} : vector<32x32xf32>, vector<32x64xf32>, vector<32x64xf32> -> vector<32x64xf32>
    %8 = vector.broadcast %2 : vector<1x64xf32> to vector<32x64xf32>
    %9 = arith.addf %7, %8 : vector<32x64xf32>
    %cst_12 = arith.constant 0.000000e+00 : f32
    %10 = vector.broadcast %cst_12 : f32 to vector<32x64xf32>
    %11 = arith.cmpf oge, %9, %10 : vector<32x64xf32>
    %cst_13 = arith.constant 0.00999999977 : f32
    %12 = vector.broadcast %cst_13 : f32 to vector<32x64xf32>
    %13 = arith.mulf %12, %9 : vector<32x64xf32>
    %14 = arith.select %11, %9, %13 : vector<32x64xi1>, vector<32x64xf32>
    %15 = vector.shape_cast %14 : vector<32x64xf32> to vector<2x16x64xf32>
    %16 = vector.shape_cast %4 : vector<2x16xf32> to vector<2x1x16xf32>
    %17 = vector.shape_cast %16 : vector<2x1x16xf32> to vector<2x1x16xf32>
    %18 = vector.broadcast %17 : vector<2x1x16xf32> to vector<2x4x16xf32>
    %19 = vector.shape_cast %3 : vector<2x16xf32> to vector<2x1x16xf32>
    %20 = vector.shape_cast %19 : vector<2x1x16xf32> to vector<2x1x16xf32>
    %21 = vector.broadcast %20 : vector<2x1x16xf32> to vector<2x4x16xf32>
    %cst_14 = arith.constant 0.000000e+00 : f32
    %22 = vector.broadcast %cst_14 : f32 to vector<2x4x16xf32>
    %23 = arith.mulf %22, %18 : vector<2x4x16xf32>
    %cst_15 = arith.constant dense<0xFF800000> : vector<2x4xf32>
    %24 = vector.multi_reduction <maximumf>, %23, %cst_15 [2] : vector<2x4x16xf32> to vector<2x4xf32>
    %25 = vector.shape_cast %24 : vector<2x4xf32> to vector<2x4x1xf32>
    %26 = vector.broadcast %25 : vector<2x4x1xf32> to vector<2x4x16xf32>
    %27 = arith.subf %23, %26 : vector<2x4x16xf32>
    %28 = math.exp %27 : vector<2x4x16xf32>
    %cst_16 = arith.constant dense<0.000000e+00> : vector<2x4xf32>
    %29 = vector.multi_reduction <add>, %28, %cst_16 [2] : vector<2x4x16xf32> to vector<2x4xf32>
    %30 = vector.shape_cast %29 : vector<2x4xf32> to vector<2x4x1xf32>
    %31 = vector.broadcast %30 : vector<2x4x1xf32> to vector<2x4x16xf32>
    %32 = arith.divf %28, %31 : vector<2x4x16xf32>
    %33 = arith.mulf %32, %21 : vector<2x4x16xf32>
    "tpu.trace_start"() <{level = 10 : i32, message = "bht,btn->bhn"}> : () -> ()
    %cst_17 = arith.constant dense<0.000000e+00> : vector<2x4x64xf32>
    %34 = tpu.matmul %33, %15, %cst_17 {dimension_numbers = #tpu.dot_dimension_numbers<[2], [1], [1], [2], [0, 0, 0, 1, 1, 2], [0], [0]>} : vector<2x4x16xf32>, vector<2x16x64xf32>, vector<2x4x64xf32> -> vector<2x4x64xf32>
    "tpu.trace_stop"() : () -> ()
    %35 = math.tanh %34 : vector<2x4x64xf32>
    %36 = vector.shape_cast %5 : vector<4x64xf32> to vector<1x4x64xf32>
    %37 = vector.broadcast %36 : vector<1x4x64xf32> to vector<2x4x64xf32>
    %38 = arith.mulf %35, %37 : vector<2x4x64xf32>
    "tpu.trace_start"() <{level = 10 : i32, message = "bhn,btn->bht"}> : () -> ()
    %cst_18 = arith.constant dense<0.000000e+00> : vector<2x4x16xf32>
    %39 = tpu.matmul %38, %15, %cst_18 {dimension_numbers = #tpu.dot_dimension_numbers<[2], [2], [1], [1], [0, 0, 0, 1, 1, 1], [0], [0]>} : vector<2x4x64xf32>, vector<2x16x64xf32>, vector<2x4x16xf32> -> vector<2x4x16xf32>
    "tpu.trace_stop"() : () -> ()
    %40 = arith.addf %23, %39 : vector<2x4x16xf32>
    %41 = arith.mulf %40, %18 : vector<2x4x16xf32>
    %cst_19 = arith.constant dense<0xFF800000> : vector<2x4xf32>
    %42 = vector.multi_reduction <maximumf>, %41, %cst_19 [2] : vector<2x4x16xf32> to vector<2x4xf32>
    %43 = vector.shape_cast %42 : vector<2x4xf32> to vector<2x4x1xf32>
    %44 = vector.broadcast %43 : vector<2x4x1xf32> to vector<2x4x16xf32>
    %45 = arith.subf %41, %44 : vector<2x4x16xf32>
    %46 = math.exp %45 : vector<2x4x16xf32>
    %cst_20 = arith.constant dense<0.000000e+00> : vector<2x4xf32>
    %47 = vector.multi_reduction <add>, %46, %cst_20 [2] : vector<2x4x16xf32> to vector<2x4xf32>
    %48 = vector.shape_cast %47 : vector<2x4xf32> to vector<2x4x1xf32>
    %49 = vector.broadcast %48 : vector<2x4x1xf32> to vector<2x4x16xf32>
    %50 = arith.divf %46, %49 : vector<2x4x16xf32>
    %51 = arith.mulf %50, %21 : vector<2x4x16xf32>
    "tpu.trace_start"() <{level = 10 : i32, message = "bht,btn->bhn"}> : () -> ()
    %cst_21 = arith.constant dense<0.000000e+00> : vector<2x4x64xf32>
    %52 = tpu.matmul %51, %15, %cst_21 {dimension_numbers = #tpu.dot_dimension_numbers<[2], [1], [1], [2], [0, 0, 0, 1, 1, 2], [0], [0]>} : vector<2x4x16xf32>, vector<2x16x64xf32>, vector<2x4x64xf32> -> vector<2x4x64xf32>
    "tpu.trace_stop"() : () -> ()
    %53 = math.tanh %52 : vector<2x4x64xf32>
    %54 = vector.shape_cast %5 : vector<4x64xf32> to vector<1x4x64xf32>
    %55 = vector.broadcast %54 : vector<1x4x64xf32> to vector<2x4x64xf32>
    %56 = arith.mulf %53, %55 : vector<2x4x64xf32>
    %cst_22 = arith.constant dense<0.000000e+00> : vector<2x64xf32>
    %57 = vector.multi_reduction <add>, %56, %cst_22 [1] : vector<2x4x64xf32> to vector<2x64xf32>
    %c0_23 = arith.constant 0 : index
    %c0_24 = arith.constant 0 : index
    %58 = vector.load %arg7[%c0_23, %c0_24] : memref<2x64xf32, #tpu.memory_space<vmem>>, vector<2x64xf32>
    tpu.vector_store %arg7[%c0_23, %c0_24], %57 {strides = array<i32>} : memref<2x64xf32, #tpu.memory_space<vmem>>, vector<2x64xf32>,
    return
  }
  func.func @transform_0(%arg0: i32) -> (i32, i32, i32) {
    %c0_i32 = arith.constant 0 : i32
    %c0_i32_0 = arith.constant 0 : i32
    %c0_i32_1 = arith.constant 0 : i32
    return %arg0, %c0_i32, %c0_i32_0 : i32, i32, i32
  }
  func.func @transform_1(%arg0: i32) -> (i32, i32) {
    %c0_i32 = arith.constant 0 : i32
    %c0_i32_0 = arith.constant 0 : i32
    %c0_i32_1 = arith.constant 0 : i32
    return %c0_i32, %c0_i32_0 : i32, i32
  }
  func.func @transform_2(%arg0: i32) -> (i32, i32) {
    %c0_i32 = arith.constant 0 : i32
    %c0_i32_0 = arith.constant 0 : i32
    %c0_i32_1 = arith.constant 0 : i32
    return %c0_i32, %c0_i32_0 : i32, i32
  }
  func.func @transform_3(%arg0: i32) -> (i32, i32) {
    %c0_i32 = arith.constant 0 : i32
    %c0_i32_0 = arith.constant 0 : i32
    return %arg0, %c0_i32 : i32, i32
  }
  func.func @transform_4(%arg0: i32) -> (i32, i32) {
    %c0_i32 = arith.constant 0 : i32
    %c0_i32_0 = arith.constant 0 : i32
    return %arg0, %c0_i32 : i32, i32
  }
  func.func @transform_5(%arg0: i32) -> (i32, i32) {
    %c0_i32 = arith.constant 0 : i32
    %c0_i32_0 = arith.constant 0 : i32
    %c0_i32_1 = arith.constant 0 : i32
    return %c0_i32, %c0_i32_0 : i32, i32
  }
  func.func @transform_6(%arg0: i32) -> (i32, i32) {
    %c0_i32 = arith.constant 0 : i32
    %c0_i32_0 = arith.constant 0 : i32
    return %arg0, %c0_i32 : i32, i32
  }
}

</mosaic_0001>

<bundles_post_ra>
// kernel: tpu_custom_call.1
= control target key start
LH: loop header
LB: loop body
LE: loop exit
PB: predicated region body
PF: predicated region fallthrough
CT: control target
= control target key end

     0   :  { %11 = vsyncpa [#allocation3], 0  ;;  %s1201_s0 = inlined_call_operand.hbm [shape: f32[2,16,32], index: 0, kind: input, shape index: {}]   ;;  %s1202_s1 = inlined_call_operand.hbm [shape: f32[32,64], index: 1, kind: input, shape index: {}]   ;;  %s1203_s2 = inlined_call_operand.vmem [shape: f32[1,64], index: 2, kind: input, shape index: {}]   ;;  %s1204_s3 = inlined_call_operand.vmem [shape: f32[2,16], index: 3, kind: input, shape index: {}]   ;;  %s1205_s4 = inlined_call_operand.vmem [shape: f32[2,16], index: 4, kind: input, shape index: {}]   ;;  %s1206_s5 = inlined_call_operand.vmem [shape: f32[4,64], index: 5, kind: input, shape index: {}]   ;;  %s1207_s6 = inlined_call_operand.hbm [shape: f32[2,64], index: 6, kind: output, shape index: {}]  }
   0x1   :  { %12 = vsyncpa [#allocation6], 0 }
   0x2   :  { %13 = vsyncpa [#allocation4], 0  ;;  %s1031_s21 = smov [#allocation2]   ;;  %s959_s25 = scalar_lea.hbm %s1201_s0, 512 }
   0x3   :  { %s19_s22 = sshll.u32 %s1031_s21, 4  ;;  %p960_p0 = scmp.ne.s32.totalorder %s1201_s0, %s959_s25  ;;  %s20_s22 = int_to_ptr.vmem [resolvable:$true] %s19_s22 }
   0x4   :  { %p963_p1 = scmp.lt.u32.totalorder %s959_s25, %s1201_s0 }
   0x6   :  { %p965_p2 = pnand %p963_p1, %p960_p0 }
   0x8   :  { %968 = shalt.err (!%p965_p2)
}
   0x9   :  { %s969_s30 = scalar_lea.vmem %s20_s22, 512  ;;  %p974_p4 = scmp.lt.s32.totalorder %s20_s22, %s20_s22 }
   0xa   :  { %p970_p3 = scmp.ne.s32.totalorder %s20_s22, %s969_s30  ;;  %p975_p5 = scmp.lt.s32.totalorder %s969_s30, %s969_s30 }
   0xc   :  { %p976_p6 = por %p975_p5, %p974_p4 }
   0xe   :  { %p977_p7 = pnand %p976_p6, %p970_p3 }
  0x10   :  { %980 = shalt.err (!%p977_p7)
}
  0x11   :  { %s1032_s7 = smov 128   ;;  %s1033_s8 = smov 8  }
  0x12   :  { %25 = dma.hbm_to_vmem [thread:$0]  %s1201_s0, 512, %s20_s22, [#allocation3], %s1032_s7, %s1032_s7, %s1033_s8  }
  0x13   :  { %s1034_s11 = smov [#allocation5]   ;;  %s981_s15 = scalar_lea.hbm %s1202_s1, 512 }
  0x14   :  { %s31_s12 = sshll.u32 %s1034_s11, 4  ;;  %p982_p8 = scmp.ne.s32.totalorder %s1202_s1, %s981_s15  ;;  %s32_s12 = int_to_ptr.vmem [resolvable:$true] %s31_s12 }
  0x15   :  { %p985_p9 = scmp.lt.u32.totalorder %s981_s15, %s1202_s1 }
  0x17   :  { %p987_p10 = pnand %p985_p9, %p982_p8 }
  0x19   :  { %990 = shalt.err (!%p987_p10)
}
  0x1a   :  { %s991_s20 = scalar_lea.vmem %s32_s12, 512  ;;  %p996_p12 = scmp.lt.s32.totalorder %s32_s12, %s32_s12 }
  0x1b   :  { %p992_p11 = scmp.ne.s32.totalorder %s32_s12, %s991_s20  ;;  %p997_p13 = scmp.lt.s32.totalorder %s991_s20, %s991_s20 }
  0x1d   :  { %p998_p0 = por %p997_p13, %p996_p12 }
  0x1f   :  { %p999_p1 = pnand %p998_p0, %p992_p11 }
  0x21   :  { %1002 = shalt.err (!%p999_p1)
}
  0x22   :  { %37 = dma.hbm_to_vmem [thread:$0]  %s1202_s1, 512, %s32_s12, [#allocation6], %s1032_s7, %s1032_s7, %s1033_s8  }
  0x23   :  { %1025 = dma.done.wait [#allocation3], 512  }
  0x24   :  { %1026 = vsyncadd [#allocation3], 4294966784 }
  0x25   :  { %1027 = dma.done.wait [#allocation6], 512  }
  0x26   :  { %1028 = vsyncadd [#allocation6], 4294966784  ;;  %v192_v0 = vlaneseq  ;;  %v1035_v1 = vmov 1966171168   ;;  %vm70_vm0 = vcmask 261120   ;;  %v56_v8 = vld [vmem:[#allocation5] sm:$0xff] }
  0x27   :  { %v190_v2 = vunpack.c.l.s4 %v1035_v1  ;;  %v804_v7 = vld.sshfl [vmem:[%s1205_s4] sm:$0x11 pattern:$0x75316420]  ;;  %v57_v9 = vld [vmem:[#allocation5 + $0x8] sm:$0xff]  ;;  %v58_v13 = vld [vmem:[#allocation5 + $0x10] sm:$0xff] }
  0x28   :  { %v193_v3 = vshrl.u32 %v192_v0, 7  ;;  %v188_v11 = vcombine.high %v804_v7, %v804_v7  ;;  %v898_v12 = vpack.c.bf16 %v57_v9, %v56_v8  ;;  %v59_v14 = vld [vmem:[#allocation5 + $0x18] sm:$0xff]  ;;  %v52_v15 = vld [vmem:[#allocation2] sm:$0xff]  ;;  %vm248_vm1 = vcmask 130048   ;;  %v53_v23 = vld [vmem:[#allocation2 + $0x8] sm:$0xff] }
  0x29   :  { %v191_v4 = vunpack.c.0.s8 %v190_v2  ;;  %v902_v16 = vpack.c.bf16 %v59_v14, %v58_v13  ;;  %850 = vmatprep.mubr.msk.f32.mxu0 %vm70_vm0, %v52_v15  ;;  %v54_v25 = vld [vmem:[#allocation2 + $0x10] sm:$0xff]  ;;  %v55_v26 = vld [vmem:[#allocation2 + $0x18] sm:$0xff]  ;;  %v1036_v37 = vmov 0.0|0.0   ;;  %vm1037_vm2 = vmmov 0   ;;  %v799_v39 = vld [vmem:[%s1203_s2] ss:$0 sm:$0xff] }
  0x2a   :  { %v1101_v6 = vsub.s32 0, %v193_v3  ;;  %899 = vmatprep.subr.bf16.mxu0 %v898_v12  ;;  %906 = vmatprep.subr.bf16.mxu1 %v1036_v37  ;;  %v1038_v38 = vmov 0.0   ;;  %vm423_vm4 = vcmask 523264   ;;  %v63_v13 = vld [vmem:[%s1206_s5] sm:$0xf]  ;;  %vm586_vm9 = vcmask 125952  }
  0x2b   :  { %v1099_v5 = vsub.s32 %v191_v4, %v193_v3  ;;  %901 = vmatpush3.bf16.msra.mxu0 %v898_v12  ;;  %860 = vmatprep.mubr.msk.f32.mxu1 %vm1037_vm2, %v1038_v38  ;;  %vm1141_vm6 = vmpackc.low %vm423_vm4, %vm423_vm4  ;;  %v805_v60 = vld.sshfl [vmem:[%s1204_s3] sm:$0x11 pattern:$0x75316420]  ;;  %vm761_vm10 = vcmask 519168   ;;  %s1039_s5 = smov [#allocation7]  }
  0x2c   :  { %903 = vmatprep.subr.bf16.mxu0 %v902_v16  ;;  %v221_v62 = vcombine.high %v805_v60, %v805_v60  ;;  %s789_s26 = sshll.u32 %s1039_s5, 4  ;;  %vm778_vm11 = vcmask 1041409   ;;  %vm781_vm12 = vcmask 517120   ;;  %s790_s26 = int_to_ptr.vmem [resolvable:$true] %s789_s26 }
  0x2d   :  { %v195_v10 = vrot.slane %v804_v7, %v1099_v5  ;;  %v202_v18 = vrot.slane %v188_v11, %v1099_v5  ;;  %v228_v63 = vrot.slane %v805_v60, %v1099_v5  ;;  %s1003_s27 = scalar_lea.vmem %s790_s26, 32  ;;  %p1008_p3 = scmp.lt.s32.totalorder %s790_s26, %s790_s26 }
  0x2e   :  { %v235_v0 = vrot.slane %v221_v62, %v1099_v5  ;;  %p1004_p2 = scmp.ne.s32.totalorder %s790_s26, %s1003_s27  ;;  %p1009_p4 = scmp.lt.s32.totalorder %s1003_s27, %s1003_s27 }
  0x2f   :  { %v1109_v17 = vrot.slane %v195_v10, %v1101_v6  ;;  %v1116_v20 = vrot.slane %v202_v18, %v1101_v6  ;;  %905 = vmatpush3.bf16.msra.mxu0 %v902_v16  ;;  %v1153_v1 = vrot.slane %v228_v63, %v1101_v6 }
  0x30   :  { %912 = vmatprep.subr.bf16.mxu0 %v1036_v37  ;;  %v1157_v7 = vrot.slane %v235_v0, %v1101_v6  ;;  %p1010_p5 = por %p1009_p4, %p1008_p3 }
  0x31   :  { %v1113_v19 = vmul.f32 0.0, %v1109_v17  ;;  %v1121_v22 = vmul.f32 0.0, %v1116_v20 }
  0x32   :  { %851 = vmatmul.mubr.msk.f32.vlgmr.msra.gmra.mrb[0].mxu0 %vm70_vm0, %v53_v23  ;;  %p1011_p6 = pnand %p1010_p5, %p1004_p2 }
  0x33   :  { %v249_v21 = vsel %vm248_vm1, %v1113_v19, -inf  ;;  %v252_v24 = vsel %vm248_vm1, %v1121_v22, -inf  ;;  %853 = vmatprep.mubr.msk.f32.mxu0 %vm70_vm0, %v54_v25 }
  0x34   :  { %250 = vmax.xlane.f32.xlu0 %v249_v21 }
  0x36   :  { %854 = vmatmul.mubr.msk.f32.gmra.mrb[2].mxu0 %vm70_vm0, %v55_v26 }
  0x37   :  { %874 = vmatprep.mubr.msk.f32.mxu0 %vm1037_vm2, %v1038_v38 }
  0x38   :  { %253 = vmax.xlane.f32.xlu0 %v252_v24 }
  0xc1   :  { %v251_v27 = vpop.xlane.xlu0 %250 }
  0xc2   :  { %v255_v28 = vsub.f32 %v1113_v19, %v251_v27 }
  0xc4   :  { %v257_v29 = vmul.f32 1.442695, %v255_v28 }
  0xc5   :  { %v254_v30 = vpop.xlane.xlu0 %253 }
  0xc6   :  { %935 = vpow2.f32 %v257_v29  ;;  %v256_v31 = vsub.f32 %v1121_v22, %v254_v30 }
  0xc8   :  { %v259_v32 = vmul.f32 1.442695, %v256_v31 }
  0xca   :  { %937 = vpow2.f32 %v259_v32 }
  0xd0   :  { %v936_v33 = vpop.eup %935 }
  0xd1   :  { %v261_v34 = vsel %vm248_vm1, %v936_v33, 0.0 }
  0xd2   :  { %262 = vadd.xlane.f32.xlu1 %v261_v34 }
  0xd4   :  { %v938_v35 = vpop.eup %937 }
  0xd5   :  { %v264_v36 = vsel %vm248_vm1, %v938_v35, 0.0 }
  0xd6   :  { %265 = vadd.xlane.f32.xlu1 %v264_v36 }
 0x105   :  { %v852_v40 = vpop.f32.mrb[0].mxu0 }
 0x106   :  { %v155_v41 = vadd.f32 %v852_v40, %v799_v39  ;;  %v149_v42 = vpop.f32.mrb[1].mxu0 }
 0x107   :  { %v150_v43 = vadd.f32 %v799_v39, %v149_v42 }
 0x108   :  { %vm169_vm3 = vcmp.ge.f32.partialorder %v155_v41, 0.0  ;;  %v173_v44 = vmul.f32 0.01, %v155_v41 }
 0x109   :  { %vm168_vm5 = vcmp.ge.f32.partialorder %v150_v43, 0.0  ;;  %v172_v45 = vmul.f32 0.01, %v150_v43  ;;  %v855_v46 = vpop.f32.mrb[2].mxu0 }
 0x10a   :  { %v165_v47 = vadd.f32 %v855_v46, %v799_v39  ;;  %v159_v48 = vpop.f32.mrb[3].mxu0  ;;  %v177_v49 = vsel %vm169_vm3, %v155_v41, %v173_v44 }
 0x10b   :  { %v160_v50 = vadd.f32 %v799_v39, %v159_v48  ;;  %v176_v51 = vsel %vm168_vm5, %v150_v43, %v172_v45 }
 0x10c   :  { %vm171_vm7 = vcmp.ge.f32.partialorder %v165_v47, 0.0  ;;  %v175_v53 = vmul.f32 0.01, %v165_v47  ;;  %v907_v54 = vpack.c.bf16 %v177_v49, %v176_v51 }
 0x10d   :  { %vm170_vm8 = vcmp.ge.f32.partialorder %v160_v50, 0.0  ;;  %v174_v55 = vmul.f32 0.01, %v160_v50 }
 0x10e   :  { %v179_v56 = vsel %vm171_vm7, %v165_v47, %v175_v53  ;;  %908 = vmatpush3.bf16.msra.mxu1 %v907_v54  ;;  %915 = vmatpush3.bf16.xpose.msk.msra.mxu0 %vm1141_vm6, %v907_v54 }
 0x10f   :  { %v178_v57 = vsel %vm170_vm8, %v160_v50, %v174_v55  ;;  %909 = vmatprep.subr.bf16.mxu1 %v1036_v37  ;;  %920 = vmatprep.subr.bf16.mxu0 %v1036_v37 }
 0x110   :  { %v910_v58 = vpack.c.bf16 %v179_v56, %v178_v57 }
 0x15f   :  { %v263_v59 = vpop.xlane.xlu1 %262 }
 0x160   :  { %939 = vrcp.f32 %v263_v59 }
 0x163   :  { %v266_v61 = vpop.xlane.xlu1 %265 }
 0x164   :  { %941 = vrcp.f32 %v266_v61 }
 0x16a   :  { %v940_v2 = vpop.eup %939 }
 0x16b   :  { %v268_v3 = vmul.f32 %v940_v2, %v936_v33 }
 0x16d   :  { %v271_v4 = vmul.f32 %v268_v3, %v1153_v1 }
 0x16e   :  { %v942_v8 = vpop.eup %941 }
 0x16f   :  { %v270_v9 = vmul.f32 %v942_v8, %v938_v35  ;;  %861 = vmatmul.mubr.msk.f32.vlgmr.msra.gmra.mrb[0].mxu1 %vm248_vm1, %v271_v4 }
 0x170   :  { %911 = vmatpush3.bf16.msra.mxu1 %v910_v58  ;;  %867 = vmatprep.mubr.msk.f32.mxu1 %vm1037_vm2, %v1038_v38 }
 0x171   :  { %v272_v5 = vmul.f32 %v270_v9, %v1157_v7  ;;  %916 = vmatprep.subr.bf16.mxu1 %v1036_v37 }
 0x173   :  { %868 = vmatmul.mubr.msk.f32.vlgmr.msra.gmra.mrb[2].mxu1 %vm248_vm1, %v272_v5 }
 0x174   :  { %881 = vmatprep.mubr.msk.f32.mxu1 %vm1037_vm2, %v1038_v38 }
 0x179   :  { %919 = vmatpush3.bf16.xpose.msk.msra.mxu1 %vm1141_vm6, %v910_v58 }
 0x17a   :  { %923 = vmatprep.subr.bf16.mxu1 %v1036_v37 }
 0x242   :  { %v342_v6 = vpop.f32.mrb[0].mxu1 }
 0x243   :  { %943 = vtanh.f32 %v342_v6  ;;  %v862_v10 = vpop.f32.mrb[1].mxu1 }
 0x246   :  { %v415_v11 = vpop.f32.mrb[2].mxu1 }
 0x247   :  { %945 = vtanh.f32 %v415_v11  ;;  %v869_v12 = vpop.f32.mrb[3].mxu1 }
 0x24d   :  { %v944_v14 = vpop.eup %943 }
 0x24e   :  { %v421_v15 = vmul.f32 %v944_v14, %v63_v13 }
 0x250   :  { %875 = vmatmul.mubr.msk.f32.vlgmr.msra.gmra.mrb[4].mxu0 %vm423_vm4, %v421_v15 }
 0x251   :  { %v946_v16 = vpop.eup %945  ;;  %922 = vmatpush3.bf16.msra.mxu0 %v907_v54  ;;  %888 = vmatprep.mubr.msk.f32.mxu0 %vm1037_vm2, %v1038_v38 }
 0x252   :  { %v422_v18 = vmul.f32 %v946_v16, %v63_v13 }
 0x254   :  { %882 = vmatmul.mubr.msk.f32.vlgmr.msra.gmra.mrb[4].mxu1 %vm423_vm4, %v422_v18 }
 0x255   :  { %925 = vmatpush3.bf16.msra.mxu1 %v910_v58  ;;  %895 = vmatprep.mubr.msk.f32.mxu1 %vm1037_vm2, %v1038_v38 }
 0x323   :  { %v499_v21 = vpop.f32.mrb[4].mxu0 }
 0x324   :  { %v582_v23 = vadd.f32 %v499_v21, %v1113_v19  ;;  %v876_v24 = vpop.f32.mrb[5].mxu0 }
 0x326   :  { %v584_v25 = vmul.f32 %v582_v23, %v1109_v17 }
 0x327   :  { %v578_v26 = vpop.f32.mrb[4].mxu1 }
 0x328   :  { %v583_v27 = vadd.f32 %v578_v26, %v1121_v22  ;;  %v883_v28 = vpop.f32.mrb[5].mxu1  ;;  %v587_v29 = vsel %vm586_vm9, %v584_v25, -inf }
 0x329   :  { %588 = vmax.xlane.f32.xlu0 %v587_v29 }
 0x32a   :  { %v585_v30 = vmul.f32 %v583_v27, %v1116_v20 }
 0x32c   :  { %v590_v31 = vsel %vm586_vm9, %v585_v30, -inf }
 0x32d   :  { %591 = vmax.xlane.f32.xlu1 %v590_v31 }
 0x3b6   :  { %v589_v32 = vpop.xlane.xlu0 %588 }
 0x3b7   :  { %v593_v33 = vsub.f32 %v584_v25, %v589_v32 }
 0x3b9   :  { %v595_v34 = vmul.f32 1.442695, %v593_v33 }
 0x3ba   :  { %v592_v19 = vpop.xlane.xlu1 %591 }
 0x3bb   :  { %947 = vpow2.f32 %v595_v34  ;;  %v594_v35 = vsub.f32 %v585_v30, %v592_v19 }
 0x3bd   :  { %v597_v36 = vmul.f32 1.442695, %v594_v35 }
 0x3bf   :  { %949 = vpow2.f32 %v597_v36 }
 0x3c5   :  { %v948_v17 = vpop.eup %947 }
 0x3c6   :  { %v599_v22 = vsel %vm586_vm9, %v948_v17, 0.0 }
 0x3c7   :  { %600 = vadd.xlane.f32.xlu0 %v599_v22 }
 0x3c9   :  { %v950_v37 = vpop.eup %949 }
 0x3ca   :  { %v602_v38 = vsel %vm586_vm9, %v950_v37, 0.0 }
 0x3cb   :  { %603 = vadd.xlane.f32.xlu1 %v602_v38 }
 0x454   :  { %v601_v20 = vpop.xlane.xlu0 %600 }
 0x455   :  { %951 = vrcp.f32 %v601_v20 }
 0x458   :  { %v604_v39 = vpop.xlane.xlu1 %603 }
 0x459   :  { %953 = vrcp.f32 %v604_v39 }
 0x45f   :  { %v952_v40 = vpop.eup %951 }
 0x460   :  { %v606_v41 = vmul.f32 %v952_v40, %v948_v17 }
 0x462   :  { %v609_v42 = vmul.f32 %v606_v41, %v1153_v1 }
 0x463   :  { %v954_v43 = vpop.eup %953 }
 0x464   :  { %v608_v44 = vmul.f32 %v954_v43, %v950_v37  ;;  %889 = vmatmul.mubr.msk.f32.vlgmr.msra.gmra.mrb[6].mxu0 %vm248_vm1, %v609_v42 }
 0x466   :  { %v610_v45 = vmul.f32 %v608_v44, %v1157_v7 }
 0x468   :  { %896 = vmatmul.mubr.msk.f32.vlgmr.msra.gmra.mrb[6].mxu1 %vm248_vm1, %v610_v45 }
 0x537   :  { %v680_v46 = vpop.f32.mrb[6].mxu0 }
 0x538   :  { %955 = vtanh.f32 %v680_v46  ;;  %v890_v47 = vpop.f32.mrb[7].mxu0 }
 0x53b   :  { %v753_v48 = vpop.f32.mrb[6].mxu1 }
 0x53c   :  { %957 = vtanh.f32 %v753_v48  ;;  %v897_v49 = vpop.f32.mrb[7].mxu1 }
 0x542   :  { %v956_v50 = vpop.eup %955 }
 0x543   :  { %v759_v51 = vmul.f32 %v956_v50, %v63_v13 }
 0x545   :  { %v762_v52 = vsel %vm761_vm10, %v759_v51, 0.0 }
 0x546   :  { %v958_v53 = vpop.eup %957  ;;  %v763_v54 = vrot.slane %v762_v52, 4 }
 0x547   :  { %v760_v55 = vmul.f32 %v958_v53, %v63_v13 }
 0x548   :  { %v764_v56 = vadd.f32 %v763_v54, %v762_v52 }
 0x549   :  { %v769_v57 = vsel %vm761_vm10, %v760_v55, 0.0 }
 0x54a   :  { %v765_v58 = vrot.slane %v764_v56, 2  ;;  %v770_v59 = vrot.slane %v769_v57, 4 }
 0x54c   :  { %v766_v60 = vadd.f32 %v765_v58, %v764_v56  ;;  %v771_v61 = vadd.f32 %v770_v59, %v769_v57 }
 0x54e   :  { %v772_v62 = vrot.slane %v771_v61, 2  ;;  %v767_v63 = vrot.slane %v766_v60, 1 }
 0x550   :  { %v773_v0 = vadd.f32 %v772_v62, %v771_v61  ;;  %v768_v2 = vadd.f32 %v767_v63, %v766_v60 }
 0x552   :  { %v774_v1 = vrot.slane %v773_v0, 1 }
 0x554   :  { %v775_v3 = vadd.f32 %v774_v1, %v773_v0 }
 0x556   :  { %v779_v4 = vsel %vm778_vm11, %v775_v3, %v768_v2 }
 0x557   :  { %782 = vst.msk [vmem:[#allocation7] sm:$0x3] %vm781_vm12, %v779_v4 }
 0x558   :  { %1014 = shalt.err (!%p1011_p6)
}
 0x559   :  { %s1015_s30 = scalar_lea.hbm %s1207_s6, 32 }
 0x55a   :  { %p1016_p7 = scmp.ne.s32.totalorder %s1207_s6, %s1015_s30  ;;  %p1019_p8 = scmp.lt.u32.totalorder %s1015_s30, %s1207_s6 }
 0x55c   :  { %p1021_p9 = pnand %p1019_p8, %p1016_p7 }
 0x55e   :  { %1024 = shalt.err (!%p1021_p9)
}
 0x55f   :  { %792 = dma.vmem_to_hbm [thread:$0]  %s790_s26, 32, %s1207_s6, [#allocation4]  }
 0x560   :  { %1029 = dma.done.wait [#allocation4], 32  }
 0x561   :  { %1030 = vsyncadd [#allocation4], 4294967264 }
 0x562   :  { %796 = vsyncpa [#allocation3], 1 }
 0x563   :  { %797 = vsyncpa [#allocation6], 1 }
 0x564   :  { %798 = vsyncpa [#allocation4], 1 }

</bundles_post_ra>
